<compile_context>
chip_gen: v7x
topology: tpu7x:2x2x1
jax: 0.10.0
libtpu: 0.0.40
codegen_flags: <defaults>
</compile_context>

<pallas_src>
import functools

import jax
import jax.numpy as jnp
from jax.experimental import pallas as pl
from jax.experimental.pallas import tpu as pltpu

LANE = 128  # TPU lane width; pad last dims to a multiple of this.


def round_up(x, m):
    return ((x + m - 1) // m) * m


def pick_tile(n, candidates=(512, 256, 128)):
    """Largest tile from `candidates` that divides n (n is padded to a 128-multiple)."""
    for t in candidates:
        if n % t == 0:
            return t
    return n


# ----------------------------- Pallas kernels ------------------------------


def lgcn_hop_kernel(adj_ref, prev_ref, accin_ref, next_ref, accout_ref, acc_ref, *, out_scale):
    """One LightGCN hop tile: next = adj @ prev ; acc_out = (acc_in + next) * out_scale.

    Grid = (row_tiles, k_tiles); k (the reduction over adjacency columns) is last.
    acc_ref is an f32 VMEM accumulator that lives across the k axis.
    """
    k = pl.program_id(1)

    @pl.when(k == 0)
    def _():
        acc_ref[...] = jnp.zeros_like(acc_ref)

    # bf16 x bf16 on the MXU, accumulated in f32.
    acc_ref[...] += jnp.dot(adj_ref[...], prev_ref[...], preferred_element_type=jnp.float32)

    @pl.when(k == pl.num_programs(1) - 1)
    def _():
        nxt = acc_ref[...]
        next_ref[...] = nxt.astype(next_ref.dtype)
        # Fold the running layer sum (and, on the last hop, the 1/(n_layers+1) mean) in here
        # so normalization is a single VPU multiply per output tile.
        accout_ref[...] = ((accin_ref[...] + nxt) * out_scale).astype(accout_ref.dtype)


def lgcn_hop(adj, prev, acc_in, *, out_scale):
    """Tiled, pipelined (adj @ prev) with fused running-sum update."""
    N, D = prev.shape  # N, D already padded to 128-multiples
    tm = pick_tile(N)
    tk = pick_tile(N)
    grid = (N // tm, N // tk)
    return pl.pallas_call(
        functools.partial(lgcn_hop_kernel, out_scale=float(out_scale)),
        out_shape=(
            jax.ShapeDtypeStruct((N, D), jnp.bfloat16),  # next layer embedding (MXU input dtype)
            jax.ShapeDtypeStruct((N, D), jnp.float32),   # running sum / mean (kept in f32)
        ),
        grid=grid,
        in_specs=[
            pl.BlockSpec((tm, tk), lambda i, k: (i, k)),  # adj tile
            pl.BlockSpec((tk, D), lambda i, k: (k, 0)),   # prev-layer strip
            pl.BlockSpec((tm, D), lambda i, k: (i, 0)),   # running sum (read once per row tile)
        ],
        out_specs=(
            pl.BlockSpec((tm, D), lambda i, k: (i, 0)),
            pl.BlockSpec((tm, D), lambda i, k: (i, 0)),
        ),
        scratch_shapes=[pltpu.VMEM((tm, D), jnp.float32)],
        compiler_params=pltpu.CompilerParams(
            # row-tile axis parallel (megacore sharding on v7x), reduction axis arbitrary.
            dimension_semantics=("parallel", "arbitrary"),
        ),
    )(adj, prev, acc_in)


def lgcn_encode(adj_bf16, ego_f32, n_layers):
    """LightGCN encoder: mean over [E, A@E, A@A@E, ...]; adj streamed once per hop."""
    if n_layers == 0:
        return ego_f32
    inv = 1.0 / float(n_layers + 1)
    acc = ego_f32                         # f32 running sum (starts at layer-0 embeddings)
    prev = ego_f32.astype(jnp.bfloat16)   # bf16 operand for the MXU
    for layer in range(n_layers):
        scale = inv if layer == n_layers - 1 else 1.0
        prev, acc = lgcn_hop(adj_bf16, prev, acc, out_scale=scale)
    return acc


def predict_target_kernel(x_ref, his_ref, w_ref, b_ref, pred_ref, tgt_ref, *, momentum):
    """Fused predictor linear (x @ W + b) + momentum target (his*m + x*(1-m))."""
    x = x_ref[...]
    pred = jnp.dot(x, w_ref[...], preferred_element_type=jnp.float32) + b_ref[...]
    pred_ref[...] = pred.astype(pred_ref.dtype)
    tgt_ref[...] = (his_ref[...] * momentum + x * (1.0 - momentum)).astype(tgt_ref.dtype)


def predict_and_target(x, his, w_t, b, momentum):
    """Single pallas_call for the concatenated (user + item) batch; weight DMA'd once."""
    B, D = x.shape
    return pl.pallas_call(
        functools.partial(predict_target_kernel, momentum=float(momentum)),
        out_shape=(
            jax.ShapeDtypeStruct((B, D), jnp.float32),
            jax.ShapeDtypeStruct((B, D), jnp.float32),
        ),
        in_specs=[pl.BlockSpec(memory_space=pltpu.MemorySpace.VMEM)] * 4,
        out_specs=(
            pl.BlockSpec(memory_space=pltpu.MemorySpace.VMEM),
            pl.BlockSpec(memory_space=pltpu.MemorySpace.VMEM),
        ),
    )(x, his, w_t, b)


# ----------------------------- Model wrapper -------------------------------


def selfcf_he_forward(params, state, users, items, *, momentum, n_layers):
    """Functional equivalent of SelfCF_HE.forward.

    Returns ((pred_u, u_target, pred_i, i_target), new_state) where new_state carries the
    updated u_target_his / i_target_his buffers (PyTorch mutates them in place with the
    *online* embeddings, matching the SELFRec reference).  Forward-only: the torch.no_grad /
    .data detach semantics of the target branch are irrelevant here (no custom VJP defined).
    """
    user_emb = params["user_emb"]
    item_emb = params["item_emb"]
    user_num, D = user_emb.shape
    item_num = item_emb.shape[0]
    N = user_num + item_num

    adj = params["norm_adj"]          # [N_pad, N_pad] bf16, zero-padded at init
    N_pad = adj.shape[0]
    D_pad = round_up(D, LANE)

    # --- LGCN_Encoder.forward() ---
    ego = jnp.concatenate([user_emb, item_emb], axis=0)
    ego = jnp.pad(ego, ((0, N_pad - N), (0, D_pad - D)))
    all_emb = lgcn_encode(adj, ego, n_layers)        # [N_pad, D_pad] f32

    u_online = all_emb[:user_num]                    # keep lane padding for the predictor
    i_online = all_emb[user_num:N]

    # --- gather the batch rows (glue) ---
    u_sel = jnp.take(u_online, users, axis=0)        # [Bu, D_pad]
    i_sel = jnp.take(i_online, items, axis=0)        # [Bi, D_pad]
    u_his = jnp.pad(jnp.take(state["u_target_his"], users, axis=0), ((0, 0), (0, D_pad - D)))
    i_his = jnp.pad(jnp.take(state["i_target_his"], items, axis=0), ((0, 0), (0, D_pad - D)))

    w_pad = jnp.pad(params["pred_w_t"], ((0, D_pad - D), (0, D_pad - D)))
    b_pad = jnp.pad(params["pred_b"], ((0, 0), (0, D_pad - D)))

    # --- predictor + momentum target (one fused Pallas kernel for users+items) ---
    Bu, Bi = u_sel.shape[0], i_sel.shape[0]
    B = Bu + Bi
    B_pad = round_up(B, 8)
    x = jnp.concatenate([u_sel, i_sel], axis=0)
    his = jnp.concatenate([u_his, i_his], axis=0)
    if B_pad != B:
        x = jnp.pad(x, ((0, B_pad - B), (0, 0)))
        his = jnp.pad(his, ((0, B_pad - B), (0, 0)))

    pred, tgt = predict_and_target(x, his, w_pad, b_pad, momentum)

    u_pred, i_pred = pred[:Bu, :D], pred[Bu:B, :D]
    u_target, i_target = tgt[:Bu, :D], tgt[Bu:B, :D]

    # --- history scatter update (glue; functional stand-in for in-place write).
    # Stores the *online* embeddings, like the PyTorch reference.  Duplicate indices follow
    # JAX's last-write-wins semantics.
    new_state = {
        "u_target_his": state["u_target_his"].at[users].set(u_sel[:, :D]),
        "i_target_his": state["i_target_his"].at[items].set(i_sel[:, :D]),
    }
    return (u_pred, u_target, i_pred, i_target), new_state


# ----------------------------- Param init ----------------------------------


def xavier_uniform(key, shape):
    fan_in, fan_out = shape[0], shape[1]
    bound = (6.0 / (fan_in + fan_out)) ** 0.5
    return jax.random.uniform(key, shape, jnp.float32, minval=-bound, maxval=bound)


def init_params_and_state(key, user_num, item_num, emb_size):
    keys = jax.random.split(key, 7)
    N = user_num + item_num
    N_pad = round_up(N, LANE)
    # Dense synthetic row-normalized adjacency (stand-in for data.norm_adj). Stored in bf16
    # (MXU-native, halves HBM traffic on the adjacency stream) and zero-padded to 128-multiples
    # once at init so the tiled kernel never needs per-call padding of the [N,N] matrix.
    adj_raw = jax.random.uniform(keys[0], (N, N), jnp.float32)
    adj = adj_raw / jnp.sum(adj_raw, axis=1, keepdims=True)
    adj = jnp.pad(adj, ((0, N_pad - N), (0, N_pad - N))).astype(jnp.bfloat16)
    # Predictor nn.Linear(D, D): kaiming-uniform-ish init, stored pre-transposed as [in, out].
    w_bound = (1.0 / emb_size) ** 0.5
    w = jax.random.uniform(keys[3], (emb_size, emb_size), jnp.float32, -w_bound, w_bound)
    b = jax.random.uniform(keys[4], (1, emb_size), jnp.float32, -w_bound, w_bound)
    params = {
        "norm_adj": adj,
        "user_emb": xavier_uniform(keys[1], (user_num, emb_size)),
        "item_emb": xavier_uniform(keys[2], (item_num, emb_size)),
        "pred_w_t": w.T,  # [in, out]
        "pred_b": b,
    }
    state = {
        "u_target_his": jax.random.normal(keys[5], (user_num, emb_size), jnp.float32),
        "i_target_his": jax.random.normal(keys[6], (item_num, emb_size), jnp.float32),
    }
    return params, state


# ----------------------------- Main -----------------------------------------

if __name__ == "__main__":
    user_num, item_num = 8, 8
    emb_size = 32
    n_layers = 2
    momentum = 0.5
    batch = 8

    key = jax.random.PRNGKey(0)
    params, state = init_params_and_state(key, user_num, item_num, emb_size)

    k_u, k_i = jax.random.split(jax.random.PRNGKey(1))
    users = jax.random.randint(k_u, (batch,), 0, user_num, dtype=jnp.int32)
    items = jax.random.randint(k_i, (batch,), 0, item_num, dtype=jnp.int32)

    forward = jax.jit(
        functools.partial(selfcf_he_forward, momentum=momentum, n_layers=n_layers)
    )
    (u_pred, u_target, i_pred, i_target), new_state = forward(params, state, users, items)

    jax.block_until_ready((u_pred, u_target, i_pred, i_target, new_state))

    assert u_pred.shape == (batch, emb_size)
    assert u_target.shape == (batch, emb_size)
    assert i_pred.shape == (batch, emb_size)
    assert i_target.shape == (batch, emb_size)
    assert new_state["u_target_his"].shape == (user_num, emb_size)
    assert new_state["i_target_his"].shape == (item_num, emb_size)
    print("KERNEL_OK")
</pallas_src>

<mosaic_0001>
module attributes {stable_mosaic.version = 11 : i64} {
  func.func @lgcn_hop_kernel(%arg0: i32, %arg1: i32, %arg2: memref<128x128xbf16, #tpu.memory_space<vmem>>, %arg3: memref<128x128xbf16, #tpu.memory_space<vmem>>, %arg4: memref<128x128xf32, #tpu.memory_space<vmem>>, %arg5: memref<128x128xbf16, #tpu.memory_space<vmem>>, %arg6: memref<128x128xf32, #tpu.memory_space<vmem>>, %arg7: memref<128x128xf32, #tpu.memory_space<vmem>>) attributes {dimension_semantics = [#tpu.dimension_semantics<parallel>, #tpu.dimension_semantics<arbitrary>], iteration_bounds = array<i64: 1, 1>, scalar_prefetch = 0 : i64, scratch_operands = 1 : i64, tpu.core_type = #tpu.core_type<tc>, window_params = [{transform_indices = @transform_0, window_bounds = array<i64: 128, 128>}, {transform_indices = @transform_1, window_bounds = array<i64: 128, 128>}, {transform_indices = @transform_2, window_bounds = array<i64: 128, 128>}, {transform_indices = @transform_3, window_bounds = array<i64: 128, 128>}, {transform_indices = @transform_4, window_bounds = array<i64: 128, 128>}]} {
    %c0_i32 = arith.constant 0 : i32
    %0 = arith.cmpi eq, %arg1, %c0_i32 : i32
    %1 = arith.extui %0 : i1 to i32
    %c0_i32_0 = arith.constant 0 : i32
    %2 = arith.cmpi ne, %1, %c0_i32_0 : i32
    scf.if %2 {
      %cst_10 = arith.constant 0.000000e+00 : f32
      %12 = vector.broadcast %cst_10 : f32 to vector<128x128xf32>
      %c0_11 = arith.constant 0 : index
      %c0_12 = arith.constant 0 : index
      %13 = vector.load %arg7[%c0_11, %c0_12] : memref<128x128xf32, #tpu.memory_space<vmem>>, vector<128x128xf32>
      tpu.vector_store %arg7[%c0_11, %c0_12], %12 {strides = array<i32>} : memref<128x128xf32, #tpu.memory_space<vmem>>, vector<128x128xf32>,
    } else {
    }
    %c0 = arith.constant 0 : index
    %c0_1 = arith.constant 0 : index
    %3 = vector.load %arg7[%c0, %c0_1] : memref<128x128xf32, #tpu.memory_space<vmem>>, vector<128x128xf32>
    %c0_2 = arith.constant 0 : index
    %c0_3 = arith.constant 0 : index
    %4 = vector.load %arg2[%c0_2, %c0_3] : memref<128x128xbf16, #tpu.memory_space<vmem>>, vector<128x128xbf16>
    %c0_4 = arith.constant 0 : index
    %c0_5 = arith.constant 0 : index
    %5 = vector.load %arg3[%c0_4, %c0_5] : memref<128x128xbf16, #tpu.memory_space<vmem>>, vector<128x128xbf16>
    %cst = arith.constant dense<0.000000e+00> : vector<128x128xf32>
    %6 = tpu.matmul %4, %5, %cst {dimension_numbers = #tpu.dot_dimension_numbers<[1], [0], [0], [1], [0, 0, 1, 1], [], []>} : vector<128x128xbf16>, vector<128x128xbf16>, vector<128x128xf32> -> vector<128x128xf32>
    %7 = arith.addf %3, %6 : vector<128x128xf32>
    %c0_6 = arith.constant 0 : index
    %c0_7 = arith.constant 0 : index
    %8 = vector.load %arg7[%c0_6, %c0_7] : memref<128x128xf32, #tpu.memory_space<vmem>>, vector<128x128xf32>
    tpu.vector_store %arg7[%c0_6, %c0_7], %7 {strides = array<i32>} : memref<128x128xf32, #tpu.memory_space<vmem>>, vector<128x128xf32>,
    %c0_i32_8 = arith.constant 0 : i32
    %9 = arith.cmpi eq, %arg1, %c0_i32_8 : i32
    %10 = arith.extui %9 : i1 to i32
    %c0_i32_9 = arith.constant 0 : i32
    %11 = arith.cmpi ne, %10, %c0_i32_9 : i32
    scf.if %11 {
      %c0_10 = arith.constant 0 : index
      %c0_11 = arith.constant 0 : index
      %12 = vector.load %arg7[%c0_10, %c0_11] : memref<128x128xf32, #tpu.memory_space<vmem>>, vector<128x128xf32>
      %13 = arith.truncf %12 : vector<128x128xf32> to vector<128x128xbf16>
      %c0_12 = arith.constant 0 : index
      %c0_13 = arith.constant 0 : index
      %14 = vector.load %arg5[%c0_12, %c0_13] : memref<128x128xbf16, #tpu.memory_space<vmem>>, vector<128x128xbf16>
      tpu.vector_store %arg5[%c0_12, %c0_13], %13 {strides = array<i32>} : memref<128x128xbf16, #tpu.memory_space<vmem>>, vector<128x128xbf16>,
      %c0_14 = arith.constant 0 : index
      %c0_15 = arith.constant 0 : index
      %15 = vector.load %arg4[%c0_14, %c0_15] : memref<128x128xf32, #tpu.memory_space<vmem>>, vector<128x128xf32>
      %16 = arith.addf %15, %12 : vector<128x128xf32>
      %cst_16 = arith.constant 0.333333343 : f32
      %17 = vector.broadcast %cst_16 : f32 to vector<128x128xf32>
      %18 = arith.mulf %16, %17 : vector<128x128xf32>
      %c0_17 = arith.constant 0 : index
      %c0_18 = arith.constant 0 : index
      %19 = vector.load %arg6[%c0_17, %c0_18] : memref<128x128xf32, #tpu.memory_space<vmem>>, vector<128x128xf32>
      tpu.vector_store %arg6[%c0_17, %c0_18], %18 {strides = array<i32>} : memref<128x128xf32, #tpu.memory_space<vmem>>, vector<128x128xf32>,
    } else {
    }
    return
  }
  func.func @transform_0(%arg0: i32, %arg1: i32) -> (i32, i32) {
    %c0_i32 = arith.constant 0 : i32
    return %arg0, %arg1 : i32, i32
  }
  func.func @transform_1(%arg0: i32, %arg1: i32) -> (i32, i32) {
    %c0_i32 = arith.constant 0 : i32
    %c0_i32_0 = arith.constant 0 : i32
    return %arg1, %c0_i32 : i32, i32
  }
  func.func @transform_2(%arg0: i32, %arg1: i32) -> (i32, i32) {
    %c0_i32 = arith.constant 0 : i32
    %c0_i32_0 = arith.constant 0 : i32
    return %arg0, %c0_i32 : i32, i32
  }
  func.func @transform_3(%arg0: i32, %arg1: i32) -> (i32, i32) {
    %c0_i32 = arith.constant 0 : i32
    %c0_i32_0 = arith.constant 0 : i32
    return %arg0, %c0_i32 : i32, i32
  }
  func.func @transform_4(%arg0: i32, %arg1: i32) -> (i32, i32) {
    %c0_i32 = arith.constant 0 : i32
    %c0_i32_0 = arith.constant 0 : i32
    return %arg0, %c0_i32 : i32, i32
  }
}

module attributes {stable_mosaic.version = 11 : i64} {
  func.func @lgcn_hop_kernel(%arg0: i32, %arg1: i32, %arg2: memref<128x128xbf16, #tpu.memory_space<vmem>>, %arg3: memref<128x128xbf16, #tpu.memory_space<vmem>>, %arg4: memref<128x128xf32, #tpu.memory_space<vmem>>, %arg5: memref<128x128xbf16, #tpu.memory_space<vmem>>, %arg6: memref<128x128xf32, #tpu.memory_space<vmem>>, %arg7: memref<128x128xf32, #tpu.memory_space<vmem>>) attributes {dimension_semantics = [#tpu.dimension_semantics<parallel>, #tpu.dimension_semantics<arbitrary>], iteration_bounds = array<i64: 1, 1>, scalar_prefetch = 0 : i64, scratch_operands = 1 : i64, tpu.core_type = #tpu.core_type<tc>, window_params = [{transform_indices = @transform_0, window_bounds = array<i64: 128, 128>}, {transform_indices = @transform_1, window_bounds = array<i64: 128, 128>}, {transform_indices = @transform_2, window_bounds = array<i64: 128, 128>}, {transform_indices = @transform_3, window_bounds = array<i64: 128, 128>}, {transform_indices = @transform_4, window_bounds = array<i64: 128, 128>}]} {
    %c0_i32 = arith.constant 0 : i32
    %0 = arith.cmpi eq, %arg1, %c0_i32 : i32
    %1 = arith.extui %0 : i1 to i32
    %c0_i32_0 = arith.constant 0 : i32
    %2 = arith.cmpi ne, %1, %c0_i32_0 : i32
    scf.if %2 {
      %cst_10 = arith.constant 0.000000e+00 : f32
      %12 = vector.broadcast %cst_10 : f32 to vector<128x128xf32>
      %c0_11 = arith.constant 0 : index
      %c0_12 = arith.constant 0 : index
      %13 = vector.load %arg7[%c0_11, %c0_12] : memref<128x128xf32, #tpu.memory_space<vmem>>, vector<128x128xf32>
      tpu.vector_store %arg7[%c0_11, %c0_12], %12 {strides = array<i32>} : memref<128x128xf32, #tpu.memory_space<vmem>>, vector<128x128xf32>,
    } else {
    }
    %c0 = arith.constant 0 : index
    %c0_1 = arith.constant 0 : index
    %3 = vector.load %arg7[%c0, %c0_1] : memref<128x128xf32, #tpu.memory_space<vmem>>, vector<128x128xf32>
    %c0_2 = arith.constant 0 : index
    %c0_3 = arith.constant 0 : index
    %4 = vector.load %arg2[%c0_2, %c0_3] : memref<128x128xbf16, #tpu.memory_space<vmem>>, vector<128x128xbf16>
    %c0_4 = arith.constant 0 : index
    %c0_5 = arith.constant 0 : index
    %5 = vector.load %arg3[%c0_4, %c0_5] : memref<128x128xbf16, #tpu.memory_space<vmem>>, vector<128x128xbf16>
    %cst = arith.constant dense<0.000000e+00> : vector<128x128xf32>
    %6 = tpu.matmul %4, %5, %cst {dimension_numbers = #tpu.dot_dimension_numbers<[1], [0], [0], [1], [0, 0, 1, 1], [], []>} : vector<128x128xbf16>, vector<128x128xbf16>, vector<128x128xf32> -> vector<128x128xf32>
    %7 = arith.addf %3, %6 : vector<128x128xf32>
    %c0_6 = arith.constant 0 : index
    %c0_7 = arith.constant 0 : index
    %8 = vector.load %arg7[%c0_6, %c0_7] : memref<128x128xf32, #tpu.memory_space<vmem>>, vector<128x128xf32>
    tpu.vector_store %arg7[%c0_6, %c0_7], %7 {strides = array<i32>} : memref<128x128xf32, #tpu.memory_space<vmem>>, vector<128x128xf32>,
    %c0_i32_8 = arith.constant 0 : i32
    %9 = arith.cmpi eq, %arg1, %c0_i32_8 : i32
    %10 = arith.extui %9 : i1 to i32
    %c0_i32_9 = arith.constant 0 : i32
    %11 = arith.cmpi ne, %10, %c0_i32_9 : i32
    scf.if %11 {
      %c0_10 = arith.constant 0 : index
      %c0_11 = arith.constant 0 : index
      %12 = vector.load %arg7[%c0_10, %c0_11] : memref<128x128xf32, #tpu.memory_space<vmem>>, vector<128x128xf32>
      %13 = arith.truncf %12 : vector<128x128xf32> to vector<128x128xbf16>
      %c0_12 = arith.constant 0 : index
      %c0_13 = arith.constant 0 : index
      %14 = vector.load %arg5[%c0_12, %c0_13] : memref<128x128xbf16, #tpu.memory_space<vmem>>, vector<128x128xbf16>
      tpu.vector_store %arg5[%c0_12, %c0_13], %13 {strides = array<i32>} : memref<128x128xbf16, #tpu.memory_space<vmem>>, vector<128x128xbf16>,
      %c0_14 = arith.constant 0 : index
      %c0_15 = arith.constant 0 : index
      %15 = vector.load %arg4[%c0_14, %c0_15] : memref<128x128xf32, #tpu.memory_space<vmem>>, vector<128x128xf32>
      %16 = arith.addf %15, %12 : vector<128x128xf32>
      %cst_16 = arith.constant 1.000000e+00 : f32
      %17 = vector.broadcast %cst_16 : f32 to vector<128x128xf32>
      %18 = arith.mulf %16, %17 : vector<128x128xf32>
      %c0_17 = arith.constant 0 : index
      %c0_18 = arith.constant 0 : index
      %19 = vector.load %arg6[%c0_17, %c0_18] : memref<128x128xf32, #tpu.memory_space<vmem>>, vector<128x128xf32>
      tpu.vector_store %arg6[%c0_17, %c0_18], %18 {strides = array<i32>} : memref<128x128xf32, #tpu.memory_space<vmem>>, vector<128x128xf32>,
    } else {
    }
    return
  }
  func.func @transform_0(%arg0: i32, %arg1: i32) -> (i32, i32) {
    %c0_i32 = arith.constant 0 : i32
    return %arg0, %arg1 : i32, i32
  }
  func.func @transform_1(%arg0: i32, %arg1: i32) -> (i32, i32) {
    %c0_i32 = arith.constant 0 : i32
    %c0_i32_0 = arith.constant 0 : i32
    return %arg1, %c0_i32 : i32, i32
  }
  func.func @transform_2(%arg0: i32, %arg1: i32) -> (i32, i32) {
    %c0_i32 = arith.constant 0 : i32
    %c0_i32_0 = arith.constant 0 : i32
    return %arg0, %c0_i32 : i32, i32
  }
  func.func @transform_3(%arg0: i32, %arg1: i32) -> (i32, i32) {
    %c0_i32 = arith.constant 0 : i32
    %c0_i32_0 = arith.constant 0 : i32
    return %arg0, %c0_i32 : i32, i32
  }
  func.func @transform_4(%arg0: i32, %arg1: i32) -> (i32, i32) {
    %c0_i32 = arith.constant 0 : i32
    %c0_i32_0 = arith.constant 0 : i32
    return %arg0, %c0_i32 : i32, i32
  }
}

module attributes {stable_mosaic.version = 11 : i64} {
  func.func @predict_target_kernel(%arg0: memref<16x128xf32, #tpu.memory_space<vmem>>, %arg1: memref<16x128xf32, #tpu.memory_space<vmem>>, %arg2: memref<128x128xf32, #tpu.memory_space<vmem>>, %arg3: memref<1x128xf32, #tpu.memory_space<vmem>>, %arg4: memref<16x128xf32, #tpu.memory_space<vmem>>, %arg5: memref<16x128xf32, #tpu.memory_space<vmem>>) attributes {dimension_semantics = [], scalar_prefetch = 0 : i64, scratch_operands = 0 : i64, tpu.core_type = #tpu.core_type<tc>} {
    %c0 = arith.constant 0 : index
    %c0_0 = arith.constant 0 : index
    %0 = vector.load %arg0[%c0, %c0_0] : memref<16x128xf32, #tpu.memory_space<vmem>>, vector<16x128xf32>
    %c0_1 = arith.constant 0 : index
    %c0_2 = arith.constant 0 : index
    %1 = vector.load %arg2[%c0_1, %c0_2] : memref<128x128xf32, #tpu.memory_space<vmem>>, vector<128x128xf32>
    %cst = arith.constant dense<0.000000e+00> : vector<16x128xf32>
    %2 = tpu.matmul %0, %1, %cst {dimension_numbers = #tpu.dot_dimension_numbers<[1], [0], [0], [1], [0, 0, 1, 1], [], []>} : vector<16x128xf32>, vector<128x128xf32>, vector<16x128xf32> -> vector<16x128xf32>
    %c0_3 = arith.constant 0 : index
    %c0_4 = arith.constant 0 : index
    %3 = vector.load %arg3[%c0_3, %c0_4] : memref<1x128xf32, #tpu.memory_space<vmem>>, vector<1x128xf32>
    %4 = vector.broadcast %3 : vector<1x128xf32> to vector<16x128xf32>
    %5 = arith.addf %2, %4 : vector<16x128xf32>
    %c0_5 = arith.constant 0 : index
    %c0_6 = arith.constant 0 : index
    %6 = vector.load %arg4[%c0_5, %c0_6] : memref<16x128xf32, #tpu.memory_space<vmem>>, vector<16x128xf32>
    tpu.vector_store %arg4[%c0_5, %c0_6], %5 {strides = array<i32>} : memref<16x128xf32, #tpu.memory_space<vmem>>, vector<16x128xf32>,
    %c0_7 = arith.constant 0 : index
    %c0_8 = arith.constant 0 : index
    %7 = vector.load %arg1[%c0_7, %c0_8] : memref<16x128xf32, #tpu.memory_space<vmem>>, vector<16x128xf32>
    %cst_9 = arith.constant 5.000000e-01 : f32
    %8 = vector.broadcast %cst_9 : f32 to vector<16x128xf32>
    %9 = arith.mulf %7, %8 : vector<16x128xf32>
    %cst_10 = arith.constant 5.000000e-01 : f32
    %10 = vector.broadcast %cst_10 : f32 to vector<16x128xf32>
    %11 = arith.mulf %0, %10 : vector<16x128xf32>
    %12 = arith.addf %9, %11 : vector<16x128xf32>
    %c0_11 = arith.constant 0 : index
    %c0_12 = arith.constant 0 : index
    %13 = vector.load %arg5[%c0_11, %c0_12] : memref<16x128xf32, #tpu.memory_space<vmem>>, vector<16x128xf32>
    tpu.vector_store %arg5[%c0_11, %c0_12], %12 {strides = array<i32>} : memref<16x128xf32, #tpu.memory_space<vmem>>, vector<16x128xf32>,
    return
  }
}

</mosaic_0001>

<bundles_post_ra>
// kernel: selfcf_he_forward.5
= control target key start
LH: loop header
LB: loop body
LE: loop exit
PB: predicated region body
PF: predicated region fallthrough
CT: control target
= control target key end

     0   :  { %s330_s2 = inlined_call_operand.vmem [shape: f32[128,128], index: 2, kind: input, shape index: {}]   ;;  %s331_s0 = inlined_call_operand.vmem [shape: f32[16,128], index: 0, kind: input, shape index: {}]   ;;  %s332_s1 = inlined_call_operand.vmem [shape: f32[16,128], index: 1, kind: input, shape index: {}]   ;;  %s333_s5 = inlined_call_operand.vmem [shape: f32[16,128], index: 5, kind: output, shape index: {1}]   ;;  %s334_s3 = inlined_call_operand.vmem [shape: f32[1,128], index: 3, kind: input, shape index: {}]   ;;  %s335_s4 = inlined_call_operand.vmem [shape: f32[16,128], index: 4, kind: output, shape index: {0}]  }
   0x1   :  { %v21_v0 = vld [vmem:[%s330_s2] sm:$0xff]  ;;  %v22_v1 = vld [vmem:[%s330_s2 + $0x8] sm:$0xff]  ;;  %v23_v2 = vld [vmem:[%s330_s2 + $0x10] sm:$0xff] }
   0x2   :  { %v193_v3 = vpack.c.bf16 %v22_v1, %v21_v0  ;;  %v24_v4 = vld [vmem:[%s330_s2 + $0x18] sm:$0xff]  ;;  %v25_v6 = vld [vmem:[%s330_s2 + $0x20] sm:$0xff]  ;;  %v26_v7 = vld [vmem:[%s330_s2 + $0x28] sm:$0xff] }
   0x3   :  { %v197_v5 = vpack.c.bf16 %v24_v4, %v23_v2  ;;  %v201_v8 = vpack.c.bf16 %v26_v7, %v25_v6  ;;  %v27_v9 = vld [vmem:[%s330_s2 + $0x30] sm:$0xff]  ;;  %v19_v10 = vld [vmem:[%s331_s0] sm:$0xff]  ;;  %v28_v12 = vld [vmem:[%s330_s2 + $0x38] sm:$0xff] }
   0x4   :  { %194 = vmatprep.subr.bf16.mxu0 %v193_v3  ;;  %v121_v11 = vld [vmem:[%s332_s1] sm:$0xff]  ;;  %190 = vmatprep.mubr.f32.mxu0 %v19_v10  ;;  %v125_v14 = vmul.f32 0.5, %v19_v10  ;;  %v20_v15 = vld [vmem:[%s331_s0 + $0x8] sm:$0xff]  ;;  %v205_v20 = vpack.c.bf16 %v28_v12, %v27_v9  ;;  %v31_v25 = vld [vmem:[%s330_s2 + $0x50] sm:$0xff] }
   0x5   :  { %196 = vmatpush3.bf16.msra.mxu0 %v193_v3  ;;  %v123_v13 = vmul.f32 0.5, %v121_v11  ;;  %v122_v16 = vld [vmem:[%s332_s1 + $0x8] sm:$0xff]  ;;  %v126_v18 = vmul.f32 0.5, %v20_v15  ;;  %v29_v22 = vld [vmem:[%s330_s2 + $0x40] sm:$0xff]  ;;  %v32_v26 = vld [vmem:[%s330_s2 + $0x58] sm:$0xff] }
   0x6   :  { %198 = vmatprep.subr.bf16.mxu0 %v197_v5  ;;  %v124_v17 = vmul.f32 0.5, %v122_v16  ;;  %v30_v23 = vld [vmem:[%s330_s2 + $0x48] sm:$0xff]  ;;  %v213_v27 = vpack.c.bf16 %v32_v26, %v31_v25  ;;  %v33_v28 = vld [vmem:[%s330_s2 + $0x60] sm:$0xff]  ;;  %v35_v31 = vld [vmem:[%s330_s2 + $0x70] sm:$0xff] }
   0x7   :  { %v127_v19 = vadd.f32 %v125_v14, %v123_v13  ;;  %v209_v24 = vpack.c.bf16 %v30_v23, %v29_v22  ;;  %v34_v29 = vld [vmem:[%s330_s2 + $0x68] sm:$0xff]  ;;  %v36_v32 = vld [vmem:[%s330_s2 + $0x78] sm:$0xff]  ;;  %v139_v34 = vld [vmem:[%s334_s3] ss:$0 sm:$0xff] }
   0x8   :  { %v128_v21 = vadd.f32 %v126_v18, %v124_v17  ;;  %v217_v30 = vpack.c.bf16 %v34_v29, %v33_v28  ;;  %v221_v33 = vpack.c.bf16 %v36_v32, %v35_v31 }
   0x9   :  { %200 = vmatpush3.bf16.msra.mxu0 %v197_v5  ;;  %129 = vst [vmem:[%s333_s5] sm:$0xff] %v127_v19 }
   0xa   :  { %202 = vmatprep.subr.bf16.mxu0 %v201_v8  ;;  %130 = vst [vmem:[%s333_s5 + $0x8] sm:$0xff] %v128_v21 }
   0xd   :  { %204 = vmatpush3.bf16.msra.mxu0 %v201_v8 }
   0xe   :  { %206 = vmatprep.subr.bf16.mxu0 %v205_v20 }
  0x11   :  { %208 = vmatpush3.bf16.msra.mxu0 %v205_v20 }
  0x12   :  { %210 = vmatprep.subr.bf16.mxu0 %v209_v24 }
  0x15   :  { %212 = vmatpush3.bf16.msra.mxu0 %v209_v24 }
  0x16   :  { %214 = vmatprep.subr.bf16.mxu0 %v213_v27 }
  0x19   :  { %216 = vmatpush3.bf16.msra.mxu0 %v213_v27 }
  0x1a   :  { %218 = vmatprep.subr.bf16.mxu0 %v217_v30 }
  0x1d   :  { %220 = vmatpush3.bf16.msra.mxu0 %v217_v30 }
  0x1e   :  { %222 = vmatprep.subr.bf16.mxu0 %v221_v33 }
  0x21   :  { %224 = vmatpush3.bf16.msra.mxu0 %v221_v33 }
  0x24   :  { %191 = vmatmul.mubr.f32.vlgmr.msra.gmra.mrb[0].mxu0 %v20_v15 }
  0xf7   :  { %v192_v35 = vpop.f32.mrb[0].mxu0 }
  0xf8   :  { %v116_v36 = vadd.f32 %v192_v35, %v139_v34  ;;  %v110_v37 = vpop.f32.mrb[1].mxu0 }
  0xf9   :  { %v111_v38 = vadd.f32 %v139_v34, %v110_v37 }
  0xfa   :  { %120 = vst [vmem:[%s335_s4 + $0x8] sm:$0xff] %v116_v36 }
  0xfb   :  { %119 = vst [vmem:[%s335_s4] sm:$0xff] %v111_v38 }

// kernel: selfcf_he_forward.4
= control target key start
LH: loop header
LB: loop body
LE: loop exit
PB: predicated region body
PF: predicated region fallthrough
CT: control target
= control target key end

     0   :  { %s887_s0 = inlined_call_operand.vmem [shape: bf16[128,128], index: 0, kind: input, shape index: {}]   ;;  %s888_s1 = inlined_call_operand.vmem [shape: bf16[128,128], index: 1, kind: input, shape index: {}]   ;;  %s889_s2 = inlined_call_operand.vmem [shape: f32[128,128], index: 2, kind: input, shape index: {}]   ;;  %s890_s3 = inlined_call_operand.hbm [shape: bf16[128,128], index: 3, kind: output, shape index: {0}]   ;;  %s891_s4 = inlined_call_operand.vmem [shape: f32[128,128], index: 4, kind: output, shape index: {1}]  }
   0x1   :  { %v656_v0 = vld [vmem:[%s888_s1] sm:$0xff]   ;;  %v657_v1 = vld [vmem:[%s888_s1 + $0x8] sm:$0xff]   ;;  %v658_v2 = vld [vmem:[%s888_s1 + $0x10] sm:$0xff]  }
   0x2   :  { %605 = vmatprep.subr.bf16.mxu0 %v656_v0  ;;  %637 = vmatprep.subr.bf16.mxu1 %v656_v0  ;;  %v659_v3 = vld [vmem:[%s888_s1 + $0x18] sm:$0xff]   ;;  %v664_v4 = vld [vmem:[%s887_s0] sm:$0xff]   ;;  %v661_v7 = vld [vmem:[%s888_s1 + $0x28] sm:$0xff]  }
   0x3   :  { %606 = vmatpush3.bf16.msra.mxu0 %v656_v0  ;;  %645 = vmatpush3.bf16.msra.mxu1 %v656_v0  ;;  %v665_v5 = vld [vmem:[%s887_s0 + $0x20] sm:$0xff]  }
   0x4   :  { %607 = vmatprep.subr.bf16.mxu0 %v657_v1  ;;  %638 = vmatprep.subr.bf16.mxu1 %v657_v1  ;;  %v660_v6 = vld [vmem:[%s888_s1 + $0x20] sm:$0xff]  }
   0x5   :  { %621 = vmatprep.mubr.bf16.mxu0 %v664_v4  ;;  %629 = vmatprep.mubr.bf16.mxu1 %v665_v5 }
   0x7   :  { %608 = vmatpush3.bf16.msra.mxu0 %v657_v1  ;;  %646 = vmatpush3.bf16.msra.mxu1 %v657_v1 }
   0x8   :  { %609 = vmatprep.subr.bf16.mxu0 %v658_v2  ;;  %639 = vmatprep.subr.bf16.mxu1 %v658_v2 }
   0xb   :  { %610 = vmatpush3.bf16.msra.mxu0 %v658_v2  ;;  %647 = vmatpush3.bf16.msra.mxu1 %v658_v2 }
   0xc   :  { %611 = vmatprep.subr.bf16.mxu0 %v659_v3  ;;  %640 = vmatprep.subr.bf16.mxu1 %v659_v3 }
   0xf   :  { %612 = vmatpush3.bf16.msra.mxu0 %v659_v3  ;;  %648 = vmatpush3.bf16.msra.mxu1 %v659_v3 }
  0x10   :  { %613 = vmatprep.subr.bf16.mxu0 %v660_v6  ;;  %641 = vmatprep.subr.bf16.mxu1 %v660_v6 }
  0x11   :  { %10 = vsyncpa [#allocation4], 0  ;;  %v662_v8 = vld [vmem:[%s888_s1 + $0x30] sm:$0xff]   ;;  %v663_v9 = vld [vmem:[%s888_s1 + $0x38] sm:$0xff]   ;;  %s696_s7 = smov [#allocation3]  }
  0x12   :  { %v666_v10 = vld [vmem:[%s887_s0 + $0x8] sm:$0xff]   ;;  %v668_v12 = vld [vmem:[%s887_s0 + $0x10] sm:$0xff]   ;;  %v670_v14 = vld [vmem:[%s887_s0 + $0x18] sm:$0xff]   ;;  %s479_s8 = sshll.u32 %s696_s7, 4  ;;  %s844_s8 = int_to_ptr.vmem [resolvable:$true] %s479_s8 }
  0x13   :  { %614 = vmatpush3.bf16.msra.mxu0 %v660_v6  ;;  %649 = vmatpush3.bf16.msra.mxu1 %v660_v6  ;;  %v667_v11 = vld [vmem:[%s887_s0 + $0x28] sm:$0xff]   ;;  %v669_v13 = vld [vmem:[%s887_s0 + $0x30] sm:$0xff]   ;;  %v671_v15 = vld [vmem:[%s887_s0 + $0x38] sm:$0xff]   ;;  %s672_s25 = scalar_lea.vmem %s844_s8, 1024  ;;  %p677_p1 = scmp.lt.s32.totalorder %s844_s8, %s844_s8 }
  0x14   :  { %615 = vmatprep.subr.bf16.mxu0 %v661_v7  ;;  %642 = vmatprep.subr.bf16.mxu1 %v661_v7  ;;  %v412_v16 = vld [vmem:[%s889_s2 + $0x10] sm:$0xff]  ;;  %v410_v18 = vld [vmem:[%s889_s2] sm:$0xff]  ;;  %v413_v22 = vld [vmem:[%s889_s2 + $0x18] sm:$0xff]  ;;  %p673_p0 = scmp.ne.s32.totalorder %s844_s8, %s672_s25  ;;  %p678_p2 = scmp.lt.s32.totalorder %s672_s25, %s672_s25 }
  0x15   :  { %v420_v17 = vld [vmem:[%s889_s2 + $0x50] sm:$0xff]  ;;  %v418_v19 = vld [vmem:[%s889_s2 + $0x40] sm:$0xff]  ;;  %v421_v27 = vld [vmem:[%s889_s2 + $0x58] sm:$0xff] }
  0x16   :  { %v411_v32 = vld [vmem:[%s889_s2 + $0x8] sm:$0xff]  ;;  %v416_v50 = vld [vmem:[%s889_s2 + $0x30] sm:$0xff]  ;;  %v414_v53 = vld [vmem:[%s889_s2 + $0x20] sm:$0xff]  ;;  %p679_p3 = por %p678_p2, %p677_p1 }
  0x17   :  { %616 = vmatpush3.bf16.msra.mxu0 %v661_v7  ;;  %650 = vmatpush3.bf16.msra.mxu1 %v661_v7  ;;  %v419_v33 = vld [vmem:[%s889_s2 + $0x48] sm:$0xff]  ;;  %v424_v51 = vld [vmem:[%s889_s2 + $0x70] sm:$0xff]  ;;  %v422_v54 = vld [vmem:[%s889_s2 + $0x60] sm:$0xff] }
  0x18   :  { %617 = vmatprep.subr.bf16.mxu0 %v662_v8  ;;  %643 = vmatprep.subr.bf16.mxu1 %v662_v8  ;;  %v417_v58 = vld [vmem:[%s889_s2 + $0x38] sm:$0xff]  ;;  %v415_v4 = vld [vmem:[%s889_s2 + $0x28] sm:$0xff]  ;;  %p680_p4 = pnand %p679_p3, %p673_p0 }
  0x19   :  { %v425_v63 = vld [vmem:[%s889_s2 + $0x78] sm:$0xff]  ;;  %v423_v5 = vld [vmem:[%s889_s2 + $0x68] sm:$0xff] }
  0x1b   :  { %618 = vmatpush3.bf16.msra.mxu0 %v662_v8  ;;  %651 = vmatpush3.bf16.msra.mxu1 %v662_v8 }
  0x1c   :  { %619 = vmatprep.subr.bf16.mxu0 %v663_v9  ;;  %644 = vmatprep.subr.bf16.mxu1 %v663_v9 }
  0x1f   :  { %620 = vmatpush3.bf16.msra.mxu0 %v663_v9  ;;  %652 = vmatpush3.bf16.msra.mxu1 %v663_v9 }
  0x22   :  { %622 = vmatmul.mubr.bf16.vlgmr.msra.gmra.mrb[0].mxu0 %v666_v10  ;;  %630 = vmatmul.mubr.bf16.vlgmr.msra.gmra.mrb[0].mxu1 %v667_v11 }
  0x23   :  { %625 = vmatprep.mubr.bf16.mxu0 %v668_v12  ;;  %633 = vmatprep.mubr.bf16.mxu1 %v669_v13 }
  0x2a   :  { %626 = vmatmul.mubr.bf16.gmra.mrb[4].mxu0 %v670_v14  ;;  %634 = vmatmul.mubr.bf16.gmra.mrb[4].mxu1 %v671_v15 }
  0xf5   :  { %v623_v20 = vpop.f32.mrb[0].mxu0  ;;  %v631_v21 = vpop.f32.mrb[0].mxu1 }
  0xf6   :  { %v428_v23 = vadd.f32 %v623_v20, %v412_v16  ;;  %v436_v24 = vadd.f32 %v631_v21, %v420_v17  ;;  %v216_v25 = vpop.f32.mrb[1].mxu0  ;;  %v248_v26 = vpop.f32.mrb[1].mxu1 }
  0xf7   :  { %v426_v28 = vadd.f32 %v410_v18, %v216_v25  ;;  %v434_v29 = vadd.f32 %v418_v19, %v248_v26  ;;  %v624_v30 = vpop.f32.mrb[2].mxu0  ;;  %v632_v31 = vpop.f32.mrb[2].mxu1 }
  0xf8   :  { %v444_v34 = vmul.f32 0.33333334, %v428_v23  ;;  %v452_v35 = vmul.f32 0.33333334, %v436_v24  ;;  %v550_v36 = vpack.c.bf16 %v624_v30, %v623_v20  ;;  %v429_v37 = vadd.f32 %v624_v30, %v413_v22  ;;  %v219_v38 = vpop.f32.mrb[3].mxu0  ;;  %v251_v39 = vpop.f32.mrb[3].mxu1 }
  0xf9   :  { %v442_v40 = vmul.f32 0.33333334, %v426_v28  ;;  %v450_v41 = vmul.f32 0.33333334, %v434_v29  ;;  %v570_v42 = vpack.c.bf16 %v632_v31, %v631_v21  ;;  %v437_v43 = vadd.f32 %v632_v31, %v421_v27 }
  0xfa   :  { %460 = vst [vmem:[%s891_s4 + $0x10] sm:$0xff] %v444_v34  ;;  %468 = vst [vmem:[%s891_s4 + $0x50] sm:$0xff] %v452_v35  ;;  %v445_v44 = vmul.f32 0.33333334, %v429_v37  ;;  %v545_v45 = vpack.c.bf16 %v219_v38, %v216_v25  ;;  %v427_v46 = vadd.f32 %v411_v32, %v219_v38  ;;  %v565_v47 = vpack.c.bf16 %v251_v39, %v248_v26 }
  0xfb   :  { %582 = vst [vmem:[#allocation3 + $0x8] sm:$0xff] %v550_v36   ;;  %458 = vst [vmem:[%s891_s4] sm:$0xff] %v442_v40  ;;  %v453_v48 = vmul.f32 0.33333334, %v437_v43  ;;  %v435_v49 = vadd.f32 %v419_v33, %v251_v39 }
  0xfc   :  { %466 = vst [vmem:[%s891_s4 + $0x40] sm:$0xff] %v450_v41  ;;  %586 = vst [vmem:[#allocation3 + $0x28] sm:$0xff] %v570_v42   ;;  %v443_v52 = vmul.f32 0.33333334, %v427_v46 }
  0xfd   :  { %461 = vst [vmem:[%s891_s4 + $0x18] sm:$0xff] %v445_v44  ;;  %546 = vst [vmem:[#allocation3] sm:$0xff] %v545_v45   ;;  %v451_v55 = vmul.f32 0.33333334, %v435_v49  ;;  %v627_v56 = vpop.f32.mrb[4].mxu0  ;;  %v635_v57 = vpop.f32.mrb[4].mxu1 }
  0xfe   :  { %585 = vst [vmem:[#allocation3 + $0x20] sm:$0xff] %v565_v47   ;;  %469 = vst [vmem:[%s891_s4 + $0x58] sm:$0xff] %v453_v48  ;;  %v432_v59 = vadd.f32 %v627_v56, %v416_v50  ;;  %v440_v60 = vadd.f32 %v635_v57, %v424_v51  ;;  %v232_v61 = vpop.f32.mrb[5].mxu0  ;;  %v264_v62 = vpop.f32.mrb[5].mxu1 }
  0xff   :  { %459 = vst [vmem:[%s891_s4 + $0x8] sm:$0xff] %v443_v52  ;;  %467 = vst [vmem:[%s891_s4 + $0x48] sm:$0xff] %v451_v55  ;;  %v430_v0 = vadd.f32 %v414_v53, %v232_v61  ;;  %v438_v1 = vadd.f32 %v422_v54, %v264_v62  ;;  %v628_v2 = vpop.f32.mrb[6].mxu0  ;;  %v636_v3 = vpop.f32.mrb[6].mxu1 }
 0x100   :  { %v448_v6 = vmul.f32 0.33333334, %v432_v59  ;;  %v456_v7 = vmul.f32 0.33333334, %v440_v60  ;;  %v560_v8 = vpack.c.bf16 %v628_v2, %v627_v56  ;;  %v433_v9 = vadd.f32 %v628_v2, %v417_v58  ;;  %v235_v10 = vpop.f32.mrb[7].mxu0  ;;  %v267_v11 = vpop.f32.mrb[7].mxu1 }
 0x101   :  { %v446_v12 = vmul.f32 0.33333334, %v430_v0  ;;  %v454_v13 = vmul.f32 0.33333334, %v438_v1  ;;  %v580_v14 = vpack.c.bf16 %v636_v3, %v635_v57  ;;  %v441_v15 = vadd.f32 %v636_v3, %v425_v63 }
 0x102   :  { %464 = vst [vmem:[%s891_s4 + $0x30] sm:$0xff] %v448_v6  ;;  %472 = vst [vmem:[%s891_s4 + $0x70] sm:$0xff] %v456_v7  ;;  %v449_v16 = vmul.f32 0.33333334, %v433_v9  ;;  %v555_v17 = vpack.c.bf16 %v235_v10, %v232_v61  ;;  %v431_v18 = vadd.f32 %v415_v4, %v235_v10  ;;  %v575_v19 = vpack.c.bf16 %v267_v11, %v264_v62 }
 0x103   :  { %584 = vst [vmem:[#allocation3 + $0x18] sm:$0xff] %v560_v8   ;;  %462 = vst [vmem:[%s891_s4 + $0x20] sm:$0xff] %v446_v12  ;;  %v457_v20 = vmul.f32 0.33333334, %v441_v15  ;;  %v439_v21 = vadd.f32 %v423_v5, %v267_v11 }
 0x104   :  { %470 = vst [vmem:[%s891_s4 + $0x60] sm:$0xff] %v454_v13  ;;  %588 = vst [vmem:[#allocation3 + $0x38] sm:$0xff] %v580_v14   ;;  %v447_v22 = vmul.f32 0.33333334, %v431_v18 }
 0x105   :  { %465 = vst [vmem:[%s891_s4 + $0x38] sm:$0xff] %v449_v16  ;;  %583 = vst [vmem:[#allocation3 + $0x10] sm:$0xff] %v555_v17   ;;  %v455_v23 = vmul.f32 0.33333334, %v439_v21 }
 0x106   :  { %587 = vst [vmem:[#allocation3 + $0x30] sm:$0xff] %v575_v19   ;;  %473 = vst [vmem:[%s891_s4 + $0x78] sm:$0xff] %v457_v20 }
 0x107   :  { %683 = shalt.err (!%p680_p4)
}
 0x108   :  { %s684_s0 = scalar_lea.hbm %s890_s3, 1024 }
 0x109   :  { %p685_p5 = scmp.ne.s32.totalorder %s890_s3, %s684_s0  ;;  %p688_p6 = scmp.lt.u32.totalorder %s684_s0, %s890_s3 }
 0x10b   :  { %p690_p7 = pnand %p688_p6, %p685_p5 }
 0x10d   :  { %693 = shalt.err (!%p690_p7)
}
 0x10e   :  { %s697_s6 = smov 64   ;;  %s698_s7 = smov 4   ;;  %463 = vst [vmem:[%s891_s4 + $0x28] sm:$0xff] %v447_v22  ;;  %471 = vst [vmem:[%s891_s4 + $0x68] sm:$0xff] %v455_v23 }
 0x10f   :  { %485 = dma.vmem_to_hbm [thread:$0]  %s844_s8, 1024, %s890_s3, [#allocation4], %s697_s6, %s697_s6, %s698_s7  }
 0x110   :  { %694 = dma.done.wait [#allocation4], 1024  }
 0x111   :  { %695 = vsyncadd [#allocation4], 4294966272 }
 0x112   :  { %493 = vsyncpa [#allocation4], 1 }

// kernel: selfcf_he_forward.3
= control target key start
LH: loop header
LB: loop body
LE: loop exit
PB: predicated region body
PF: predicated region fallthrough
CT: control target
= control target key end

     0   :  { %s833_s1 = inlined_call_operand.vmem [shape: bf16[128,128], index: 1, kind: input, shape index: {}]   ;;  %s834_s0 = inlined_call_operand.vmem [shape: bf16[128,128], index: 0, kind: input, shape index: {}]   ;;  %s835_s2 = inlined_call_operand.vmem [shape: f32[128,128], index: 2, kind: input, shape index: {}]   ;;  %s836_s4 = inlined_call_operand.vmem [shape: f32[128,128], index: 4, kind: output, shape index: {1}]   ;;  %s837_s3 = inlined_call_operand.vmem [shape: bf16[128,128], index: 3, kind: output, shape index: {0}]  }
   0x1   :  { %v624_v0 = vld [vmem:[%s833_s1] sm:$0xff]   ;;  %v625_v1 = vld [vmem:[%s833_s1 + $0x8] sm:$0xff]   ;;  %v626_v2 = vld [vmem:[%s833_s1 + $0x10] sm:$0xff]  }
   0x2   :  { %576 = vmatprep.subr.bf16.mxu0 %v624_v0  ;;  %608 = vmatprep.subr.bf16.mxu1 %v624_v0  ;;  %v627_v3 = vld [vmem:[%s833_s1 + $0x18] sm:$0xff]   ;;  %v632_v4 = vld [vmem:[%s834_s0] sm:$0xff]   ;;  %v629_v7 = vld [vmem:[%s833_s1 + $0x28] sm:$0xff]  }
   0x3   :  { %577 = vmatpush3.bf16.msra.mxu0 %v624_v0  ;;  %616 = vmatpush3.bf16.msra.mxu1 %v624_v0  ;;  %v633_v5 = vld [vmem:[%s834_s0 + $0x20] sm:$0xff]   ;;  %v630_v8 = vld [vmem:[%s833_s1 + $0x30] sm:$0xff]   ;;  %v631_v9 = vld [vmem:[%s833_s1 + $0x38] sm:$0xff]  }
   0x4   :  { %578 = vmatprep.subr.bf16.mxu0 %v625_v1  ;;  %609 = vmatprep.subr.bf16.mxu1 %v625_v1  ;;  %v628_v6 = vld [vmem:[%s833_s1 + $0x20] sm:$0xff]   ;;  %v634_v10 = vld [vmem:[%s834_s0 + $0x8] sm:$0xff]   ;;  %v636_v12 = vld [vmem:[%s834_s0 + $0x10] sm:$0xff]  }
   0x5   :  { %592 = vmatprep.mubr.bf16.mxu0 %v632_v4  ;;  %600 = vmatprep.mubr.bf16.mxu1 %v633_v5  ;;  %v635_v11 = vld [vmem:[%s834_s0 + $0x28] sm:$0xff]   ;;  %v637_v13 = vld [vmem:[%s834_s0 + $0x30] sm:$0xff]   ;;  %v638_v14 = vld [vmem:[%s834_s0 + $0x18] sm:$0xff]  }
   0x6   :  { %v639_v15 = vld [vmem:[%s834_s0 + $0x38] sm:$0xff]   ;;  %v411_v16 = vld [vmem:[%s835_s2 + $0x10] sm:$0xff]  ;;  %v409_v18 = vld [vmem:[%s835_s2] sm:$0xff] }
   0x7   :  { %579 = vmatpush3.bf16.msra.mxu0 %v625_v1  ;;  %617 = vmatpush3.bf16.msra.mxu1 %v625_v1  ;;  %v419_v17 = vld [vmem:[%s835_s2 + $0x50] sm:$0xff]  ;;  %v417_v19 = vld [vmem:[%s835_s2 + $0x40] sm:$0xff]  ;;  %v412_v22 = vld [vmem:[%s835_s2 + $0x18] sm:$0xff] }
   0x8   :  { %580 = vmatprep.subr.bf16.mxu0 %v626_v2  ;;  %610 = vmatprep.subr.bf16.mxu1 %v626_v2  ;;  %v420_v23 = vld [vmem:[%s835_s2 + $0x58] sm:$0xff]  ;;  %v410_v28 = vld [vmem:[%s835_s2 + $0x8] sm:$0xff]  ;;  %v415_v44 = vld [vmem:[%s835_s2 + $0x30] sm:$0xff] }
   0x9   :  { %v418_v29 = vld [vmem:[%s835_s2 + $0x48] sm:$0xff]  ;;  %v423_v45 = vld [vmem:[%s835_s2 + $0x70] sm:$0xff]  ;;  %v413_v46 = vld [vmem:[%s835_s2 + $0x20] sm:$0xff] }
   0xa   :  { %v421_v47 = vld [vmem:[%s835_s2 + $0x60] sm:$0xff]  ;;  %v416_v50 = vld [vmem:[%s835_s2 + $0x38] sm:$0xff]  ;;  %v414_v56 = vld [vmem:[%s835_s2 + $0x28] sm:$0xff] }
   0xb   :  { %581 = vmatpush3.bf16.msra.mxu0 %v626_v2  ;;  %618 = vmatpush3.bf16.msra.mxu1 %v626_v2  ;;  %v424_v51 = vld [vmem:[%s835_s2 + $0x78] sm:$0xff]  ;;  %v422_v57 = vld [vmem:[%s835_s2 + $0x68] sm:$0xff] }
   0xc   :  { %582 = vmatprep.subr.bf16.mxu0 %v627_v3  ;;  %611 = vmatprep.subr.bf16.mxu1 %v627_v3 }
   0xf   :  { %583 = vmatpush3.bf16.msra.mxu0 %v627_v3  ;;  %619 = vmatpush3.bf16.msra.mxu1 %v627_v3 }
  0x10   :  { %584 = vmatprep.subr.bf16.mxu0 %v628_v6  ;;  %612 = vmatprep.subr.bf16.mxu1 %v628_v6 }
  0x13   :  { %585 = vmatpush3.bf16.msra.mxu0 %v628_v6  ;;  %620 = vmatpush3.bf16.msra.mxu1 %v628_v6 }
  0x14   :  { %586 = vmatprep.subr.bf16.mxu0 %v629_v7  ;;  %613 = vmatprep.subr.bf16.mxu1 %v629_v7 }
  0x17   :  { %587 = vmatpush3.bf16.msra.mxu0 %v629_v7  ;;  %621 = vmatpush3.bf16.msra.mxu1 %v629_v7 }
  0x18   :  { %588 = vmatprep.subr.bf16.mxu0 %v630_v8  ;;  %614 = vmatprep.subr.bf16.mxu1 %v630_v8 }
  0x1b   :  { %589 = vmatpush3.bf16.msra.mxu0 %v630_v8  ;;  %622 = vmatpush3.bf16.msra.mxu1 %v630_v8 }
  0x1c   :  { %590 = vmatprep.subr.bf16.mxu0 %v631_v9  ;;  %615 = vmatprep.subr.bf16.mxu1 %v631_v9 }
  0x1f   :  { %591 = vmatpush3.bf16.msra.mxu0 %v631_v9  ;;  %623 = vmatpush3.bf16.msra.mxu1 %v631_v9 }
  0x22   :  { %593 = vmatmul.mubr.bf16.vlgmr.msra.gmra.mrb[0].mxu0 %v634_v10  ;;  %601 = vmatmul.mubr.bf16.vlgmr.msra.gmra.mrb[0].mxu1 %v635_v11 }
  0x23   :  { %596 = vmatprep.mubr.bf16.mxu0 %v636_v12  ;;  %604 = vmatprep.mubr.bf16.mxu1 %v637_v13 }
  0x2a   :  { %597 = vmatmul.mubr.bf16.gmra.mrb[4].mxu0 %v638_v14  ;;  %605 = vmatmul.mubr.bf16.gmra.mrb[4].mxu1 %v639_v15 }
  0xf5   :  { %v594_v20 = vpop.f32.mrb[0].mxu0  ;;  %v602_v21 = vpop.f32.mrb[0].mxu1 }
  0xf6   :  { %v427_v24 = vadd.f32 %v594_v20, %v411_v16  ;;  %v435_v25 = vadd.f32 %v602_v21, %v419_v17  ;;  %v215_v26 = vpop.f32.mrb[1].mxu0  ;;  %v247_v27 = vpop.f32.mrb[1].mxu1 }
  0xf7   :  { %v425_v30 = vadd.f32 %v409_v18, %v215_v26  ;;  %v433_v31 = vadd.f32 %v417_v19, %v247_v27  ;;  %v595_v32 = vpop.f32.mrb[2].mxu0  ;;  %v603_v33 = vpop.f32.mrb[2].mxu1 }
  0xf8   :  { %443 = vst [vmem:[%s836_s4 + $0x10] sm:$0xff] %v427_v24  ;;  %451 = vst [vmem:[%s836_s4 + $0x50] sm:$0xff] %v435_v25  ;;  %v521_v34 = vpack.c.bf16 %v595_v32, %v594_v20  ;;  %v428_v35 = vadd.f32 %v595_v32, %v412_v22  ;;  %v541_v36 = vpack.c.bf16 %v603_v33, %v602_v21  ;;  %v218_v38 = vpop.f32.mrb[3].mxu0  ;;  %v250_v39 = vpop.f32.mrb[3].mxu1 }
  0xf9   :  { %v436_v37 = vadd.f32 %v603_v33, %v420_v23  ;;  %441 = vst [vmem:[%s836_s4] sm:$0xff] %v425_v30  ;;  %449 = vst [vmem:[%s836_s4 + $0x40] sm:$0xff] %v433_v31  ;;  %v516_v40 = vpack.c.bf16 %v218_v38, %v215_v26  ;;  %v426_v41 = vadd.f32 %v410_v28, %v218_v38 }
  0xfa   :  { %v536_v42 = vpack.c.bf16 %v250_v39, %v247_v27  ;;  %v434_v43 = vadd.f32 %v418_v29, %v250_v39  ;;  %553 = vst [vmem:[%s837_s3 + $0x8] sm:$0xff] %v521_v34   ;;  %444 = vst [vmem:[%s836_s4 + $0x18] sm:$0xff] %v428_v35 }
  0xfb   :  { %557 = vst [vmem:[%s837_s3 + $0x28] sm:$0xff] %v541_v36   ;;  %452 = vst [vmem:[%s836_s4 + $0x58] sm:$0xff] %v436_v37 }
  0xfc   :  { %517 = vst [vmem:[%s837_s3] sm:$0xff] %v516_v40   ;;  %442 = vst [vmem:[%s836_s4 + $0x8] sm:$0xff] %v426_v41 }
  0xfd   :  { %556 = vst [vmem:[%s837_s3 + $0x20] sm:$0xff] %v536_v42   ;;  %450 = vst [vmem:[%s836_s4 + $0x48] sm:$0xff] %v434_v43  ;;  %v598_v48 = vpop.f32.mrb[4].mxu0  ;;  %v606_v49 = vpop.f32.mrb[4].mxu1 }
  0xfe   :  { %v431_v52 = vadd.f32 %v598_v48, %v415_v44  ;;  %v439_v53 = vadd.f32 %v606_v49, %v423_v45  ;;  %v231_v54 = vpop.f32.mrb[5].mxu0  ;;  %v263_v55 = vpop.f32.mrb[5].mxu1 }
  0xff   :  { %v429_v58 = vadd.f32 %v413_v46, %v231_v54  ;;  %v437_v59 = vadd.f32 %v421_v47, %v263_v55  ;;  %v599_v60 = vpop.f32.mrb[6].mxu0  ;;  %v607_v61 = vpop.f32.mrb[6].mxu1 }
 0x100   :  { %447 = vst [vmem:[%s836_s4 + $0x30] sm:$0xff] %v431_v52  ;;  %455 = vst [vmem:[%s836_s4 + $0x70] sm:$0xff] %v439_v53  ;;  %v531_v62 = vpack.c.bf16 %v599_v60, %v598_v48  ;;  %v432_v63 = vadd.f32 %v599_v60, %v416_v50  ;;  %v551_v0 = vpack.c.bf16 %v607_v61, %v606_v49  ;;  %v234_v2 = vpop.f32.mrb[7].mxu0  ;;  %v266_v3 = vpop.f32.mrb[7].mxu1 }
 0x101   :  { %v440_v1 = vadd.f32 %v607_v61, %v424_v51  ;;  %445 = vst [vmem:[%s836_s4 + $0x20] sm:$0xff] %v429_v58  ;;  %453 = vst [vmem:[%s836_s4 + $0x60] sm:$0xff] %v437_v59  ;;  %v526_v4 = vpack.c.bf16 %v234_v2, %v231_v54  ;;  %v430_v5 = vadd.f32 %v414_v56, %v234_v2 }
 0x102   :  { %v546_v6 = vpack.c.bf16 %v266_v3, %v263_v55  ;;  %v438_v7 = vadd.f32 %v422_v57, %v266_v3  ;;  %555 = vst [vmem:[%s837_s3 + $0x18] sm:$0xff] %v531_v62   ;;  %448 = vst [vmem:[%s836_s4 + $0x38] sm:$0xff] %v432_v63 }
 0x103   :  { %559 = vst [vmem:[%s837_s3 + $0x38] sm:$0xff] %v551_v0   ;;  %456 = vst [vmem:[%s836_s4 + $0x78] sm:$0xff] %v440_v1 }
 0x104   :  { %554 = vst [vmem:[%s837_s3 + $0x10] sm:$0xff] %v526_v4   ;;  %446 = vst [vmem:[%s836_s4 + $0x28] sm:$0xff] %v430_v5 }
 0x105   :  { %558 = vst [vmem:[%s837_s3 + $0x30] sm:$0xff] %v546_v6   ;;  %454 = vst [vmem:[%s836_s4 + $0x68] sm:$0xff] %v438_v7 }

</bundles_post_ra>
